<compile_context>
chip_gen: v5e
topology: v5e:2x2
jax: 0.10.0
libtpu: 0.0.40
codegen_flags: <defaults>
</compile_context>

<pallas_src>
import functools

import jax
import jax.numpy as jnp
from jax.experimental import pallas as pl
from jax.experimental.pallas import tpu as pltpu


def _round_up(x, m):
    return (x + m - 1) // m * m


def _choose_tiles(n_base, t_max):
    """Pick (tm, tk, n_pad) with n_pad % tm == n_pad % tk == 0, tiles multiples of 128."""
    t = min(t_max, n_base)
    # Prefer a tile that divides n_base exactly (no extra adjacency padding) as long as it
    # is not so small that the ~0.35 us per-grid-step overhead dominates.
    divisors = [c for c in range(128, t + 1, 128) if n_base % c == 0]
    best = max(divisors) if divisors else 128
    if best >= min(256, t):
        tk = best
        n_pad = n_base
    else:
        tk = t
        n_pad = _round_up(n_base, tk)
    tm = tk
    # v7x has 2 TensorCores: give the "parallel" row axis >= 2 tiles when possible.
    if n_pad // tm == 1 and n_pad >= 256 and (n_pad // 2) % 128 == 0:
        tm = n_pad // 2
    return tm, tk, n_pad


# ----------------------------------------------------------------------------
# Pass 1: h = X @ W ; res = relu(X @ W_res + b_res)   (fused single matmul)
# ----------------------------------------------------------------------------
def _transform_kernel(x_ref, w_ref, bres_ref, h_ref, res_ref):
    xw = jnp.dot(x_ref[...], w_ref[...], preferred_element_type=jnp.float32)
    f = h_ref.shape[1]
    h_ref[...] = xw[:, :f].astype(h_ref.dtype)
    res_ref[...] = jnp.maximum(xw[:, f:] + bres_ref[...], 0.0).astype(res_ref.dtype)


# ----------------------------------------------------------------------------
# Pass 2: y = relu(A @ h + b_gc) + res, plus per-row-tile BN partial statistics.
# The f32 output block is resident across the k axis and used as the accumulator.
# ----------------------------------------------------------------------------
def _aggregate_kernel(a_ref, h_ref, res_ref, bgc_ref, y_ref, s_ref, ss_ref,
                      *, n_valid, tm, tk, resident_h):
    # NOTE: program ids are read only at the top level of the kernel (never inside
    # pl.when closures) and captured by value below.
    i = pl.program_id(0)
    k = pl.program_id(1)
    last_k = pl.num_programs(1) - 1
    row0 = i * tm

    if resident_h:
        h_blk = h_ref[pl.ds(k * tk, tk), :]   # h is fully VMEM-resident
    else:
        h_blk = h_ref[...]

    @pl.when(k == 0)
    def _():
        y_ref[...] = jnp.zeros_like(y_ref)

    y_ref[...] += jnp.dot(a_ref[...], h_blk, preferred_element_type=jnp.float32)

    @pl.when(k == last_k)
    def _():
        agg = jnp.maximum(y_ref[...] + bgc_ref[...], 0.0)
        y = agg + res_ref[...].astype(jnp.float32)
        # Zero padded node rows so they do not pollute the BN statistics.
        row = jax.lax.broadcasted_iota(jnp.int32, y.shape, 0) + row0
        y = jnp.where(row < n_valid, y, 0.0)
        y_ref[...] = y
        s_ref[...] = jnp.sum(y, axis=0, keepdims=True)
        ss_ref[...] = jnp.sum(y * y, axis=0, keepdims=True)


# ----------------------------------------------------------------------------
# Pass 3: BatchNorm1d normalize (training-mode batch statistics)
# ----------------------------------------------------------------------------
def _bn_kernel(y_ref, s_ref, ss_ref, gamma_ref, beta_ref, out_ref, *, n_valid, eps):
    inv_n = 1.0 / float(n_valid)
    mean = s_ref[...] * inv_n
    # NOTE: E[y^2] - E[y]^2 in f32 can cancel when |mean| >> std; acceptable for GCN
    # activations at the tested tolerance (see TODO on two-pass variance).
    var = jnp.maximum(ss_ref[...] * inv_n - mean * mean, 0.0)
    scale = jax.lax.rsqrt(var + eps) * gamma_ref[...]
    out_ref[...] = ((y_ref[...] - mean) * scale + beta_ref[...]).astype(out_ref.dtype)


# ----------------------------------------------------------------------------
# Wrapper
# ----------------------------------------------------------------------------
def gcn_layer(adj, feats, w_gc, b_gc, w_res, b_res, gamma, beta,
              *, tile=1024, eps=1e-5):
    f32, bf16 = jnp.float32, jnp.bfloat16
    N, f_in = feats.shape
    f_out = w_gc.shape[1]
    f_out_p = _round_up(f_out, 128)
    # TODO(synk): pad f_out_p to a multiple of 256 on v6e/v7x once the kernel stops
    #             being A-bandwidth-bound (fp8 / block-sparse A).

    n_base = _round_up(N, 128)
    tm, tk, n_pad = _choose_tiles(n_base, tile)
    R = n_pad // tm
    Kt = n_pad // tk

    # ---- cheap padding (A dominates all HBM traffic; only pad what is required) ----
    x_p = feats.astype(f32)
    if n_pad != N:
        x_p = jnp.pad(x_p, ((0, n_pad - N), (0, 0)))

    # 0/1 adjacency is exact in bf16; pass bf16 A from the caller to make this a no-op.
    a_p = adj.astype(bf16)
    if n_pad != N:
        a_p = jnp.pad(a_p, ((0, n_pad - N), (0, n_pad - N)))

    def pad_cols(a, cols):
        a = jnp.asarray(a, f32)
        return a if a.shape[1] == cols else jnp.pad(a, ((0, 0), (0, cols - a.shape[1])))

    w_fused = jnp.concatenate([pad_cols(w_gc, f_out_p), pad_cols(w_res, f_out_p)], axis=1)
    bgc_p = pad_cols(jnp.reshape(b_gc, (1, -1)), f_out_p)
    bres_p = pad_cols(jnp.reshape(b_res, (1, -1)), f_out_p)
    gamma_p = pad_cols(jnp.reshape(gamma, (1, -1)), f_out_p)
    beta_p = pad_cols(jnp.reshape(beta, (1, -1)), f_out_p)

    # ---- Pass 1: fused feature transform (X @ [W | W_res]) ----
    h, res = pl.pallas_call(
        _transform_kernel,
        out_shape=(jax.ShapeDtypeStruct((n_pad, f_out_p), bf16),
                   jax.ShapeDtypeStruct((n_pad, f_out_p), bf16)),
        grid=(R,),
        in_specs=[pl.BlockSpec((tm, f_in), lambda i: (i, 0)),
                  pl.BlockSpec((f_in, 2 * f_out_p), lambda i: (0, 0)),
                  pl.BlockSpec((1, f_out_p), lambda i: (0, 0))],
        out_specs=(pl.BlockSpec((tm, f_out_p), lambda i: (i, 0)),
                   pl.BlockSpec((tm, f_out_p), lambda i: (i, 0))),
        compiler_params=pltpu.CompilerParams(dimension_semantics=("parallel",)),
    )(x_p, w_fused, bres_p)

    # ---- Pass 2: tiled aggregation + fused epilogue + fused BN partial stats ----
    resident_h = n_pad * f_out_p * 2 <= (4 << 20)   # keep h fully VMEM-resident if small
    if resident_h:
        h_spec = pl.BlockSpec((n_pad, f_out_p), lambda i, k: (0, 0))
    else:
        h_spec = pl.BlockSpec((tk, f_out_p), lambda i, k: (k, 0))

    # Double-buffered VMEM budget (A tile + h + res + y + stats) with headroom; set it
    # explicitly so v5e's 16 MiB scoped default never silently bites, capped for v7x.
    vmem_need = 2 * (tm * tk * 2
                     + (n_pad if resident_h else tk) * f_out_p * 2
                     + tm * f_out_p * 2
                     + tm * f_out_p * 4
                     + 2 * f_out_p * 4) + (2 << 20)
    vmem_limit = int(min(max(vmem_need, 32 << 20), 64 << 20))

    y, s_part, ss_part = pl.pallas_call(
        functools.partial(_aggregate_kernel, n_valid=N, tm=tm, tk=tk,
                          resident_h=resident_h),
        out_shape=(jax.ShapeDtypeStruct((n_pad, f_out_p), f32),
                   jax.ShapeDtypeStruct((R, f_out_p), f32),
                   jax.ShapeDtypeStruct((R, f_out_p), f32)),
        grid=(R, Kt),
        in_specs=[pl.BlockSpec((tm, tk), lambda i, k: (i, k)),
                  h_spec,
                  pl.BlockSpec((tm, f_out_p), lambda i, k: (i, 0)),
                  pl.BlockSpec((1, f_out_p), lambda i, k: (0, 0))],
        out_specs=(pl.BlockSpec((tm, f_out_p), lambda i, k: (i, 0)),
                   pl.BlockSpec((1, f_out_p), lambda i, k: (i, 0)),
                   pl.BlockSpec((1, f_out_p), lambda i, k: (i, 0))),
        compiler_params=pltpu.CompilerParams(
            dimension_semantics=("parallel", "arbitrary"),
            vmem_limit_bytes=vmem_limit),
    )(a_p, h, res, bgc_p)

    # Tiny (R, f_out_p) remainder of the BN statistics reduction.
    y_sum = jnp.sum(s_part, axis=0, keepdims=True)
    y_sumsq = jnp.sum(ss_part, axis=0, keepdims=True)

    # ---- Pass 3: BatchNorm normalize ----
    out = pl.pallas_call(
        functools.partial(_bn_kernel, n_valid=N, eps=eps),
        out_shape=jax.ShapeDtypeStruct((n_pad, f_out_p), f32),
        grid=(R,),
        in_specs=[pl.BlockSpec((tm, f_out_p), lambda i: (i, 0)),
                  pl.BlockSpec((1, f_out_p), lambda i: (0, 0)),
                  pl.BlockSpec((1, f_out_p), lambda i: (0, 0)),
                  pl.BlockSpec((1, f_out_p), lambda i: (0, 0)),
                  pl.BlockSpec((1, f_out_p), lambda i: (0, 0))],
        out_specs=pl.BlockSpec((tm, f_out_p), lambda i: (i, 0)),
        compiler_params=pltpu.CompilerParams(dimension_semantics=("parallel",)),
    )(y, y_sum, y_sumsq, gamma_p, beta_p)

    return out[:N, :f_out]


def _reference(adj, x, w, b, wr, br, g, bt, eps=1e-5):
    agg = jax.nn.relu(adj @ (x @ w) + b)
    res = jax.nn.relu(x @ wr + br)
    y = agg + res
    mean = y.mean(axis=0, keepdims=True)
    var = ((y - mean) ** 2).mean(axis=0, keepdims=True)
    return (y - mean) * jax.lax.rsqrt(var + eps) * g + bt


if __name__ == "__main__":
    N = 16        # total nodes in the batch of graphs
    F_IN = 8      # in_feats
    F_OUT = 32    # out_feats

    key = jax.random.PRNGKey(0)
    k_x, k_a, k_w, k_wr, k_br = jax.random.split(key, 5)

    feats = jax.random.normal(k_x, (N, F_IN), dtype=jnp.float32)

    # Dense adjacency: A[i, j] = 1 iff edge j -> i (random sparse graph).
    adj_f32 = (jax.random.uniform(k_a, (N, N)) < 0.25).astype(jnp.float32)
    adj = adj_f32.astype(jnp.bfloat16)   # hand the kernel bf16 A (0/1 values are exact)

    # GraphConv params: Xavier-uniform weight, zero bias (DGL defaults).
    limit_gc = (6.0 / (F_IN + F_OUT)) ** 0.5
    w_gc = jax.random.uniform(k_w, (F_IN, F_OUT), minval=-limit_gc,
                              maxval=limit_gc, dtype=jnp.float32)
    b_gc = jnp.zeros((1, F_OUT), dtype=jnp.float32)

    # Residual nn.Linear params.
    limit_res = (1.0 / F_IN) ** 0.5
    w_res = jax.random.uniform(k_wr, (F_IN, F_OUT), minval=-limit_res,
                               maxval=limit_res, dtype=jnp.float32)
    b_res = jax.random.uniform(k_br, (1, F_OUT), minval=-limit_res,
                               maxval=limit_res, dtype=jnp.float32)

    # BatchNorm1d affine params.
    gamma = jnp.ones((1, F_OUT), dtype=jnp.float32)
    beta = jnp.zeros((1, F_OUT), dtype=jnp.float32)

    out = gcn_layer(adj, feats, w_gc, b_gc, w_res, b_res, gamma, beta)
    jax.block_until_ready(out)
    assert out.shape == (N, F_OUT)

    ref = _reference(adj_f32, feats, w_gc, b_gc, w_res, b_res, gamma, beta)
    # Loose tolerance: A@h runs with bf16 operands and h/res are stored in bf16
    # (all accumulation and BN statistics stay f32).
    assert bool(jnp.allclose(out, ref, atol=5e-2, rtol=5e-2)), "mismatch vs reference"

    print("KERNEL_OK")
</pallas_src>

<mosaic_0001>
module attributes {stable_mosaic.version = 11 : i64} {
  func.func @_transform_kernel(%arg0: i32, %arg1: memref<128x8xf32, #tpu.memory_space<vmem>>, %arg2: memref<8x256xf32, #tpu.memory_space<vmem>>, %arg3: memref<1x128xf32, #tpu.memory_space<vmem>>, %arg4: memref<128x128xbf16, #tpu.memory_space<vmem>>, %arg5: memref<128x128xbf16, #tpu.memory_space<vmem>>) attributes {dimension_semantics = [#tpu.dimension_semantics<parallel>], iteration_bounds = array<i64: 1>, scalar_prefetch = 0 : i64, scratch_operands = 0 : i64, tpu.core_type = #tpu.core_type<tc>, window_params = [{transform_indices = @transform_0, window_bounds = array<i64: 128, 8>}, {pipeline_mode = #tpu.pipeline_mode<synchronous>, transform_indices = @transform_1, window_bounds = array<i64: 8, 256>}, {pipeline_mode = #tpu.pipeline_mode<synchronous>, transform_indices = @transform_2, window_bounds = array<i64: 1, 128>}, {transform_indices = @transform_3, window_bounds = array<i64: 128, 128>}, {transform_indices = @transform_4, window_bounds = array<i64: 128, 128>}]} {
    %c0 = arith.constant 0 : index
    %c0_0 = arith.constant 0 : index
    %0 = vector.load %arg1[%c0, %c0_0] : memref<128x8xf32, #tpu.memory_space<vmem>>, vector<128x8xf32>
    %c0_1 = arith.constant 0 : index
    %c0_2 = arith.constant 0 : index
    %1 = vector.load %arg2[%c0_1, %c0_2] : memref<8x256xf32, #tpu.memory_space<vmem>>, vector<8x256xf32>
    %cst = arith.constant dense<0.000000e+00> : vector<128x256xf32>
    %2 = tpu.matmul %0, %1, %cst {dimension_numbers = #tpu.dot_dimension_numbers<[1], [0], [0], [1], [0, 0, 1, 1], [], []>} : vector<128x8xf32>, vector<8x256xf32>, vector<128x256xf32> -> vector<128x256xf32>
    %3 = vector.extract_strided_slice %2 {offsets = [0, 0], sizes = [128, 128], strides = [1, 1]} : vector<128x256xf32> to vector<128x128xf32>
    %4 = arith.truncf %3 : vector<128x128xf32> to vector<128x128xbf16>
    %c0_3 = arith.constant 0 : index
    %c0_4 = arith.constant 0 : index
    %5 = vector.load %arg4[%c0_3, %c0_4] : memref<128x128xbf16, #tpu.memory_space<vmem>>, vector<128x128xbf16>
    tpu.vector_store %arg4[%c0_3, %c0_4], %4 {strides = array<i32>} : memref<128x128xbf16, #tpu.memory_space<vmem>>, vector<128x128xbf16>,
    %6 = vector.extract_strided_slice %2 {offsets = [0, 128], sizes = [128, 128], strides = [1, 1]} : vector<128x256xf32> to vector<128x128xf32>
    %c0_5 = arith.constant 0 : index
    %c0_6 = arith.constant 0 : index
    %7 = vector.load %arg3[%c0_5, %c0_6] : memref<1x128xf32, #tpu.memory_space<vmem>>, vector<1x128xf32>
    %8 = vector.broadcast %7 : vector<1x128xf32> to vector<128x128xf32>
    %9 = arith.addf %6, %8 : vector<128x128xf32>
    %cst_7 = arith.constant 0.000000e+00 : f32
    %10 = vector.broadcast %cst_7 : f32 to vector<128x128xf32>
    %11 = arith.maximumf %9, %10 : vector<128x128xf32>
    %12 = arith.truncf %11 : vector<128x128xf32> to vector<128x128xbf16>
    %c0_8 = arith.constant 0 : index
    %c0_9 = arith.constant 0 : index
    %13 = vector.load %arg5[%c0_8, %c0_9] : memref<128x128xbf16, #tpu.memory_space<vmem>>, vector<128x128xbf16>
    tpu.vector_store %arg5[%c0_8, %c0_9], %12 {strides = array<i32>} : memref<128x128xbf16, #tpu.memory_space<vmem>>, vector<128x128xbf16>,
    return
  }
  func.func @transform_0(%arg0: i32) -> (i32, i32) {
    %c0_i32 = arith.constant 0 : i32
    %c0_i32_0 = arith.constant 0 : i32
    return %arg0, %c0_i32 : i32, i32
  }
  func.func @transform_1(%arg0: i32) -> (i32, i32) {
    %c0_i32 = arith.constant 0 : i32
    %c0_i32_0 = arith.constant 0 : i32
    %c0_i32_1 = arith.constant 0 : i32
    return %c0_i32, %c0_i32_0 : i32, i32
  }
  func.func @transform_2(%arg0: i32) -> (i32, i32) {
    %c0_i32 = arith.constant 0 : i32
    %c0_i32_0 = arith.constant 0 : i32
    %c0_i32_1 = arith.constant 0 : i32
    return %c0_i32, %c0_i32_0 : i32, i32
  }
  func.func @transform_3(%arg0: i32) -> (i32, i32) {
    %c0_i32 = arith.constant 0 : i32
    %c0_i32_0 = arith.constant 0 : i32
    return %arg0, %c0_i32 : i32, i32
  }
  func.func @transform_4(%arg0: i32) -> (i32, i32) {
    %c0_i32 = arith.constant 0 : i32
    %c0_i32_0 = arith.constant 0 : i32
    return %arg0, %c0_i32 : i32, i32
  }
}

</mosaic_0001>

<bundles_post_ra>
// kernel: tpu_custom_call.1
= control target key start
LH: loop header
LB: loop body
LE: loop exit
PB: predicated region body
PF: predicated region fallthrough
CT: control target
= control target key end

     0   :  { %10 = vsyncpa [#allocation3], 0  ;;  %vm36_vm0 = vcmask 64512   ;;  %s678_s0 = inlined_call_operand.vmem [shape: f32[128,8], index: 0, kind: input, shape index: {}]   ;;  %s679_s1 = inlined_call_operand.vmem [shape: f32[8,256], index: 1, kind: input, shape index: {}]   ;;  %s680_s2 = inlined_call_operand.vmem [shape: f32[1,128], index: 2, kind: input, shape index: {}]   ;;  %s681_s3 = inlined_call_operand.hbm [shape: bf16[128,128], index: 3, kind: output, shape index: {0}]   ;;  %s682_s4 = inlined_call_operand.hbm [shape: bf16[128,128], index: 4, kind: output, shape index: {1}]  }
   0x1   :  { %v34_v0 = vld [vmem:[%s679_s1] sm:$0xff]  ;;  %v35_v1 = vld [vmem:[%s679_s1 + $0x8] sm:$0xff] }
   0x2   :  { %v26_v2 = vld [vmem:[%s678_s0 + $0x40] sm:$0xff]  ;;  %477 = vmatpush.msra.mxu2 %v34_v0  ;;  %165 = vmatpush.msra.mxu1 %v35_v1 }
   0x3   :  { %v18_v3 = vld [vmem:[%s678_s0] sm:$0xff]  ;;  %478 = vmatpush.msra.mxu3 %v35_v1  ;;  %359 = vmatmul.msk.f32.vlgmr.msra.gmra.mxu2 %vm36_vm0, %v26_v2 }
   0x4   :  { %367 = vmatmul.msk.f32.vlgmr.msra.gmra.mxu1 %vm36_vm0, %v18_v3  ;;  %375 = vmatmul.msk.f32.vlgmr.msra.gmra.mxu3 %vm36_vm0, %v26_v2 }
   0x5   :  { %100 = vmatpush.msra.mxu0 %v34_v0 }
   0x6   :  { %11 = vsyncpa [#allocation5], 0  ;;  %351 = vmatmul.msk.f32.vlgmr.msra.gmra.mxu0 %vm36_vm0, %v18_v3  ;;  %v27_v4 = vld [vmem:[%s678_s0 + $0x48] sm:$0xff]  ;;  %v28_v6 = vld [vmem:[%s678_s0 + $0x50] sm:$0xff]  ;;  %s321_s27 = sshll.u32 %s681_s3, 4  ;;  %s537_s28 = smov [#allocation4]   ;;  %s322_s27 = int_to_ptr.hbm [resolvable:$true] %s321_s27 }
   0x7   :  { %v19_v5 = vld [vmem:[%s678_s0 + $0x8] sm:$0xff]  ;;  %v20_v7 = vld [vmem:[%s678_s0 + $0x10] sm:$0xff]  ;;  %v29_v8 = vld [vmem:[%s678_s0 + $0x58] sm:$0xff]  ;;  %s332_s29 = sshll.u32 %s537_s28, 4  ;;  %s334_s5 = sshll.u32 %s682_s4, 4  ;;  %s333_s29 = int_to_ptr.vmem [resolvable:$true] %s332_s29  ;;  %s335_s5 = int_to_ptr.hbm [resolvable:$true] %s334_s5 }
   0x8   :  { %v21_v9 = vld [vmem:[%s678_s0 + $0x18] sm:$0xff]  ;;  %v30_v10 = vld [vmem:[%s678_s0 + $0x60] sm:$0xff]  ;;  %v31_v12 = vld [vmem:[%s678_s0 + $0x68] sm:$0xff]  ;;  %s538_s6 = smov 64   ;;  %s539_s7 = smov 4  }
   0x9   :  { %v22_v11 = vld [vmem:[%s678_s0 + $0x20] sm:$0xff]  ;;  %v23_v13 = vld [vmem:[%s678_s0 + $0x28] sm:$0xff]  ;;  %v32_v14 = vld [vmem:[%s678_s0 + $0x70] sm:$0xff] }
   0xa   :  { %v24_v15 = vld [vmem:[%s678_s0 + $0x30] sm:$0xff]  ;;  %v33_v16 = vld [vmem:[%s678_s0 + $0x78] sm:$0xff]  ;;  %v654_v20 = vld [vmem:[%s680_s2] ss:$0 sm:$0xff] }
   0xb   :  { %360 = vmatmul.msk.f32.gmra.mxu2 %vm36_vm0, %v27_v4  ;;  %v25_v17 = vld [vmem:[%s678_s0 + $0x38] sm:$0xff]  ;;  %s536_s0 = smov [#allocation2]  }
   0xc   :  { %368 = vmatmul.msk.f32.gmra.mxu1 %vm36_vm0, %v19_v5  ;;  %376 = vmatmul.msk.f32.gmra.mxu3 %vm36_vm0, %v27_v4  ;;  %s319_s2 = sshll.u32 %s536_s0, 4  ;;  %s320_s2 = int_to_ptr.vmem [resolvable:$true] %s319_s2 }
   0xe   :  { %352 = vmatmul.msk.f32.gmra.mxu0 %vm36_vm0, %v19_v5 }
  0x13   :  { %361 = vmatmul.msk.f32.gmra.mxu2 %vm36_vm0, %v28_v6 }
  0x14   :  { %369 = vmatmul.msk.f32.gmra.mxu1 %vm36_vm0, %v20_v7  ;;  %377 = vmatmul.msk.f32.gmra.mxu3 %vm36_vm0, %v28_v6 }
  0x16   :  { %353 = vmatmul.msk.f32.gmra.mxu0 %vm36_vm0, %v20_v7 }
  0x1b   :  { %362 = vmatmul.msk.f32.gmra.mxu2 %vm36_vm0, %v29_v8 }
  0x1c   :  { %370 = vmatmul.msk.f32.gmra.mxu1 %vm36_vm0, %v21_v9  ;;  %378 = vmatmul.msk.f32.gmra.mxu3 %vm36_vm0, %v29_v8 }
  0x1e   :  { %354 = vmatmul.msk.f32.gmra.mxu0 %vm36_vm0, %v21_v9 }
  0x23   :  { %363 = vmatmul.msk.f32.gmra.mxu2 %vm36_vm0, %v30_v10 }
  0x24   :  { %371 = vmatmul.msk.f32.gmra.mxu1 %vm36_vm0, %v22_v11  ;;  %379 = vmatmul.msk.f32.gmra.mxu3 %vm36_vm0, %v30_v10 }
  0x26   :  { %355 = vmatmul.msk.f32.gmra.mxu0 %vm36_vm0, %v22_v11 }
  0x2b   :  { %364 = vmatmul.msk.f32.gmra.mxu2 %vm36_vm0, %v31_v12 }
  0x2c   :  { %372 = vmatmul.msk.f32.gmra.mxu1 %vm36_vm0, %v23_v13  ;;  %380 = vmatmul.msk.f32.gmra.mxu3 %vm36_vm0, %v31_v12 }
  0x2e   :  { %356 = vmatmul.msk.f32.gmra.mxu0 %vm36_vm0, %v23_v13 }
  0x33   :  { %365 = vmatmul.msk.f32.gmra.mxu2 %vm36_vm0, %v32_v14 }
  0x34   :  { %373 = vmatmul.msk.f32.gmra.mxu1 %vm36_vm0, %v24_v15  ;;  %381 = vmatmul.msk.f32.gmra.mxu3 %vm36_vm0, %v32_v14 }
  0x36   :  { %357 = vmatmul.msk.f32.gmra.mxu0 %vm36_vm0, %v24_v15 }
  0x3b   :  { %366 = vmatmul.msk.f32.gmra.mxu2 %vm36_vm0, %v33_v16 }
  0x3c   :  { %374 = vmatmul.msk.f32.gmra.mxu1 %vm36_vm0, %v25_v17  ;;  %382 = vmatmul.msk.f32.gmra.mxu3 %vm36_vm0, %v33_v16 }
  0x3e   :  { %358 = vmatmul.msk.f32.gmra.mxu0 %vm36_vm0, %v25_v17 }
  0x81   :  { %v167_v18 = vpop.f32.mrf.mxu1 }
  0x82   :  { %v251_v23 = vadd.f32 %v654_v20, %v167_v18 }
  0x83   :  { %v102_v19 = vpop.f32.mrf.mxu0 }
  0x84   :  { %v267_v27 = vmax.f32 %v251_v23, 0.0 }
  0x86   :  { %v126_v21 = vpop.f32.mrf.mxu2 }
  0x87   :  { %v191_v22 = vpop.f32.mrf.mxu3 }
  0x88   :  { %v259_v30 = vadd.f32 %v654_v20, %v191_v22 }
  0x89   :  { %v170_v24 = vpop.f32.mrf.mxu1 }
  0x8a   :  { %v252_v25 = vadd.f32 %v654_v20, %v170_v24  ;;  %v275_v37 = vmax.f32 %v259_v30, 0.0 }
  0x8b   :  { %v105_v26 = vpop.f32.mrf.mxu0 }
  0x8c   :  { %v268_v28 = vmax.f32 %v252_v25, 0.0  ;;  %v386_v29 = vpack.c.bf16 %v105_v26, %v102_v19 }
  0x8e   :  { %v426_v31 = vpack.c.bf16 %v268_v28, %v267_v27  ;;  %387 = vst [vmem:[#allocation2] sm:$0xff] %v386_v29   ;;  %v129_v32 = vpop.f32.mrf.mxu2 }
  0x8f   :  { %v406_v33 = vpack.c.bf16 %v129_v32, %v126_v21  ;;  %v194_v34 = vpop.f32.mrf.mxu3 }
  0x90   :  { %427 = vst [vmem:[#allocation4] sm:$0xff] %v426_v31   ;;  %v260_v35 = vadd.f32 %v654_v20, %v194_v34 }
  0x91   :  { %466 = vst [vmem:[#allocation2 + $0x20] sm:$0xff] %v406_v33   ;;  %v173_v36 = vpop.f32.mrf.mxu1 }
  0x92   :  { %v276_v38 = vmax.f32 %v260_v35, 0.0  ;;  %v253_v43 = vadd.f32 %v654_v20, %v173_v36 }
  0x93   :  { %v108_v39 = vpop.f32.mrf.mxu0 }
  0x94   :  { %v446_v40 = vpack.c.bf16 %v276_v38, %v275_v37  ;;  %v269_v47 = vmax.f32 %v253_v43, 0.0 }
  0x96   :  { %473 = vst [vmem:[#allocation4 + $0x20] sm:$0xff] %v446_v40   ;;  %v132_v41 = vpop.f32.mrf.mxu2 }
  0x97   :  { %v197_v42 = vpop.f32.mrf.mxu3 }
  0x98   :  { %v261_v50 = vadd.f32 %v654_v20, %v197_v42 }
  0x99   :  { %v176_v44 = vpop.f32.mrf.mxu1 }
  0x9a   :  { %v254_v45 = vadd.f32 %v654_v20, %v176_v44  ;;  %v277_v57 = vmax.f32 %v261_v50, 0.0 }
  0x9b   :  { %v111_v46 = vpop.f32.mrf.mxu0 }
  0x9c   :  { %v270_v48 = vmax.f32 %v254_v45, 0.0  ;;  %v391_v49 = vpack.c.bf16 %v111_v46, %v108_v39 }
  0x9e   :  { %v431_v51 = vpack.c.bf16 %v270_v48, %v269_v47  ;;  %463 = vst [vmem:[#allocation2 + $0x8] sm:$0xff] %v391_v49   ;;  %v135_v52 = vpop.f32.mrf.mxu2 }
  0x9f   :  { %v411_v53 = vpack.c.bf16 %v135_v52, %v132_v41  ;;  %v200_v54 = vpop.f32.mrf.mxu3 }
  0xa0   :  { %470 = vst [vmem:[#allocation4 + $0x8] sm:$0xff] %v431_v51   ;;  %v262_v55 = vadd.f32 %v654_v20, %v200_v54 }
  0xa1   :  { %467 = vst [vmem:[#allocation2 + $0x28] sm:$0xff] %v411_v53   ;;  %v179_v56 = vpop.f32.mrf.mxu1 }
  0xa2   :  { %v278_v58 = vmax.f32 %v262_v55, 0.0  ;;  %v255_v63 = vadd.f32 %v654_v20, %v179_v56 }
  0xa3   :  { %v114_v59 = vpop.f32.mrf.mxu0 }
  0xa4   :  { %v451_v60 = vpack.c.bf16 %v278_v58, %v277_v57  ;;  %v271_v3 = vmax.f32 %v255_v63, 0.0 }
  0xa6   :  { %474 = vst [vmem:[#allocation4 + $0x28] sm:$0xff] %v451_v60   ;;  %v138_v61 = vpop.f32.mrf.mxu2 }
  0xa7   :  { %v203_v62 = vpop.f32.mrf.mxu3 }
  0xa8   :  { %v263_v6 = vadd.f32 %v654_v20, %v203_v62 }
  0xa9   :  { %v182_v0 = vpop.f32.mrf.mxu1 }
  0xaa   :  { %v256_v1 = vadd.f32 %v654_v20, %v182_v0  ;;  %v279_v13 = vmax.f32 %v263_v6, 0.0 }
  0xab   :  { %v117_v2 = vpop.f32.mrf.mxu0 }
  0xac   :  { %v272_v4 = vmax.f32 %v256_v1, 0.0  ;;  %v396_v5 = vpack.c.bf16 %v117_v2, %v114_v59 }
  0xae   :  { %v436_v7 = vpack.c.bf16 %v272_v4, %v271_v3  ;;  %464 = vst [vmem:[#allocation2 + $0x10] sm:$0xff] %v396_v5   ;;  %v141_v8 = vpop.f32.mrf.mxu2 }
  0xaf   :  { %v416_v9 = vpack.c.bf16 %v141_v8, %v138_v61  ;;  %v206_v10 = vpop.f32.mrf.mxu3 }
  0xb0   :  { %471 = vst [vmem:[#allocation4 + $0x10] sm:$0xff] %v436_v7   ;;  %v264_v11 = vadd.f32 %v654_v20, %v206_v10 }
  0xb1   :  { %468 = vst [vmem:[#allocation2 + $0x30] sm:$0xff] %v416_v9   ;;  %v185_v12 = vpop.f32.mrf.mxu1 }
  0xb2   :  { %v280_v14 = vmax.f32 %v264_v11, 0.0  ;;  %v257_v19 = vadd.f32 %v654_v20, %v185_v12 }
  0xb3   :  { %v120_v15 = vpop.f32.mrf.mxu0 }
  0xb4   :  { %v456_v16 = vpack.c.bf16 %v280_v14, %v279_v13  ;;  %v273_v24 = vmax.f32 %v257_v19, 0.0 }
  0xb6   :  { %475 = vst [vmem:[#allocation4 + $0x30] sm:$0xff] %v456_v16   ;;  %v144_v17 = vpop.f32.mrf.mxu2 }
  0xb7   :  { %v209_v18 = vpop.f32.mrf.mxu3 }
  0xb8   :  { %v265_v27 = vadd.f32 %v654_v20, %v209_v18 }
  0xb9   :  { %v188_v21 = vpop.f32.mrf.mxu1 }
  0xba   :  { %v258_v22 = vadd.f32 %v654_v20, %v188_v21  ;;  %v281_v33 = vmax.f32 %v265_v27, 0.0 }
  0xbb   :  { %v123_v23 = vpop.f32.mrf.mxu0 }
  0xbc   :  { %v274_v25 = vmax.f32 %v258_v22, 0.0  ;;  %v401_v26 = vpack.c.bf16 %v123_v23, %v120_v15 }
  0xbe   :  { %v441_v28 = vpack.c.bf16 %v274_v25, %v273_v24  ;;  %465 = vst [vmem:[#allocation2 + $0x18] sm:$0xff] %v401_v26   ;;  %v147_v29 = vpop.f32.mrf.mxu2 }
  0xbf   :  { %v421_v30 = vpack.c.bf16 %v147_v29, %v144_v17  ;;  %v212_v31 = vpop.f32.mrf.mxu3 }
  0xc0   :  { %472 = vst [vmem:[#allocation4 + $0x18] sm:$0xff] %v441_v28   ;;  %v266_v32 = vadd.f32 %v654_v20, %v212_v31 }
  0xc1   :  { %469 = vst [vmem:[#allocation2 + $0x38] sm:$0xff] %v421_v30  }
  0xc2   :  { %v282_v34 = vmax.f32 %v266_v32, 0.0  ;;  %327 = dma.vmem_to_hbm [thread:$0]  %s320_s2, 1024, %s322_s27, [#allocation3], %s538_s6, %s538_s6, %s539_s7  }
  0xc4   :  { %v461_v35 = vpack.c.bf16 %v282_v34, %v281_v33 }
  0xc6   :  { %476 = vst [vmem:[#allocation4 + $0x38] sm:$0xff] %v461_v35  }
  0xc7   :  { %340 = dma.vmem_to_hbm [thread:$0]  %s333_s29, 1024, %s335_s5, [#allocation5], %s538_s6, %s538_s6, %s539_s7  }
  0xc8   :  { %532 = dma.done.wait [#allocation3], 1024  }
  0xc9   :  { %533 = vsyncadd [#allocation3], 4294966272 }
  0xca   :  { %534 = dma.done.wait [#allocation5], 1024  }
  0xcb   :  { %535 = vsyncadd [#allocation5], 4294966272 }
  0xcc   :  { %349 = vsyncpa [#allocation3], 1 }
  0xcd   :  { %350 = vsyncpa [#allocation5], 1 }

</bundles_post_ra>
